<compile_context>
chip_gen: v6e
topology: v6e:2x2x1
jax: 0.10.0
libtpu: 0.0.40
codegen_flags: <defaults>
</compile_context>

<pallas_src>
import jax
import jax.numpy as jnp
from jax.experimental import pallas as pl
from jax.experimental.pallas import tpu as pltpu


# ---- Tunables (conservative values that are safe on v5e / v6e / v7x) -------
_TM_CAP = 256            # activation rows per tile
_TK_CAP = 1024           # reduction (in_panel) tile
_TN_CAP = 1024           # output (out_panel) tile
_VMEM_LIMIT_BYTES = 32 * 1024 * 1024
_SMALL_PROBLEM_FLOPS = 2 * 256 * 256 * 256   # below this, XLA's fused dot wins


def _round_up(x: int, m: int) -> int:
    return (x + m - 1) // m * m


def _linear_kernel(x_ref, w_ref, o_ref):
    """One (TM, TN) f32 output tile, accumulated in place over the K grid axis.

    x_ref : (TM, TK) activation tile
    w_ref : (TK, TN) weight tile, already transposed at init (canonical MXU path)
    o_ref : (TM, TN) f32 output tile; its index map ignores k, so it stays
            resident in VMEM across the whole reduction (no scratch needed).
    """
    @pl.when(pl.program_id(2) == 0)
    def _():
        o_ref[...] = jnp.zeros_like(o_ref)

    o_ref[...] += jnp.dot(
        x_ref[...], w_ref[...], preferred_element_type=jnp.float32
    )


def prepare_classifier_weight(weight, *, dtype=jnp.float32):
    """One-time parameter preparation (call at init, NOT per forward).

    - Transposes the PyTorch (out_panel, in_panel) weight to (in_panel, out_panel).
    - Zero-pads K/N up to tile multiples (padded K rows contribute exactly 0).
    - Optionally casts (e.g. jnp.bfloat16) to halve streamed weight HBM bytes;
      the kernel accumulates in f32 either way.
    """
    out_panel, in_panel = weight.shape
    tk = min(_round_up(in_panel, 128), _TK_CAP)
    tn = min(_round_up(out_panel, 128), _TN_CAP)
    kp = _round_up(in_panel, tk)
    np_ = _round_up(out_panel, tn)
    w_t = jnp.asarray(weight, dtype=dtype).T            # (in_panel, out_panel)
    if (kp, np_) != (in_panel, out_panel):
        w_t = jnp.pad(w_t, ((0, kp - in_panel), (0, np_ - out_panel)))
    return w_t


def classifier_forward(x, w_prepared, out_panel, *, small_fallback=True):
    """Pallas implementation of Classifier.forward (bias-free linear).

    x          : (B, in_panel) or (in_panel,)
    w_prepared : (Kp, Np) padded/transposed weight from prepare_classifier_weight
    out_panel  : true (unpadded) number of output classes
    returns    : (B, out_panel) float32 (always 2-D, matching unsqueeze(0))
    """
    if x.ndim == 1:
        x = x[None, :]                       # matches logit.unsqueeze(0)
    B, in_panel = x.shape
    Kp, Np = w_prepared.shape
    assert in_panel <= Kp and out_panel <= Np, "weight not prepared for this shape"

    if small_fallback and 2 * B * in_panel * out_panel < _SMALL_PROBLEM_FLOPS:
        # Sub-tile problem: fixed pallas_call/grid overhead exceeds the math.
        w = w_prepared[:in_panel, :out_panel]
        return jnp.dot(x.astype(w.dtype), w, preferred_element_type=jnp.float32)

    # ---- Tile selection (consistent with prepare_classifier_weight) --------
    TM = min(_round_up(B, 8), _TM_CAP)
    TK = min(Kp, _TK_CAP)          # Kp is a multiple of TK by construction
    TN = min(Np, _TN_CAP)          # Np is a multiple of TN by construction
    Mp = _round_up(B, TM)

    # v7x megacore: keep >= 2 blocks on a "parallel" axis when the grid would
    # otherwise collapse to a single (M, N) block (no effect on v5e/v6e).
    if Mp // TM == 1 and Np // TN == 1 and TN % 256 == 0:
        TN //= 2

    # Only the (small) activation is padded per call; the weight was padded once.
    x_p = x.astype(w_prepared.dtype)
    if (Mp, Kp) != (B, in_panel):
        x_p = jnp.pad(x_p, ((0, Mp - B), (0, Kp - in_panel)))

    # N outermost, K (reduction) last.
    grid = (Np // TN, Mp // TM, Kp // TK)

    cost = pl.CostEstimate(
        flops=2 * Mp * Np * Kp,
        transcendentals=0,
        bytes_accessed=(
            Kp * Np * w_prepared.dtype.itemsize          # weight streamed ~once
            + (Np // TN) * Mp * Kp * x_p.dtype.itemsize  # x re-read per N block
            + Mp * Np * 4                                # output writeback
        ),
    )

    out_p = pl.pallas_call(
        _linear_kernel,
        out_shape=jax.ShapeDtypeStruct((Mp, Np), jnp.float32),
        grid_spec=pltpu.PrefetchScalarGridSpec(
            num_scalar_prefetch=0,
            grid=grid,
            in_specs=[
                # activations: (TM, TK) tile at block (m, k)
                pl.BlockSpec((TM, TK), lambda n, m, k: (m, k)),
                # weight (in, out): (TK, TN) tile at block (k, n)
                pl.BlockSpec((TK, TN), lambda n, m, k: (k, n)),
            ],
            # Output ignores k -> resident accumulator across the reduction.
            out_specs=pl.BlockSpec((TM, TN), lambda n, m, k: (m, n)),
        ),
        compiler_params=pltpu.CompilerParams(
            dimension_semantics=("parallel", "parallel", "arbitrary"),
            vmem_limit_bytes=_VMEM_LIMIT_BYTES,
        ),
        cost_estimate=cost,
    )(x_p, w_prepared)

    # Slice the padding back off.
    return out_p[:B, :out_panel]


def init_classifier_params(key, in_panel, out_panel):
    # Deterministic synthetic init mimicking nn.Linear's uniform(-1/sqrt(in), 1/sqrt(in)).
    bound = 1.0 / jnp.sqrt(jnp.float32(in_panel))
    weight = jax.random.uniform(
        key, (out_panel, in_panel), dtype=jnp.float32, minval=-bound, maxval=bound
    )
    return weight


if __name__ == "__main__":
    key = jax.random.PRNGKey(0)
    k_w, k_x = jax.random.split(key)

    B = 8
    in_panel = 32
    out_panel = 16

    weight = init_classifier_params(k_w, in_panel, out_panel)   # PyTorch (out, in) layout
    x = jax.random.normal(k_x, (B, in_panel), dtype=jnp.float32)

    # One-time parameter preparation (outside the per-call path).
    w_prep = prepare_classifier_weight(weight)

    # Force the Pallas path even at demo shapes so the kernel is exercised.
    logit = classifier_forward(x, w_prep, out_panel, small_fallback=False)
    logit = jax.block_until_ready(logit)

    # Reference check against plain JAX (same math as torch F.linear, no bias).
    ref = x @ weight.T
    assert logit.shape == (B, out_panel)
    assert jnp.allclose(logit, ref, atol=1e-5, rtol=1e-5)

    # 1-D input path (matches the unsqueeze(0) behavior).
    logit_1d = jax.block_until_ready(
        classifier_forward(x[0], w_prep, out_panel, small_fallback=False)
    )
    assert logit_1d.shape == (1, out_panel)
    assert jnp.allclose(logit_1d[0], ref[0], atol=1e-5, rtol=1e-5)

    # Small-problem fast path parity (plain dot fallback).
    logit_fb = jax.block_until_ready(classifier_forward(x, w_prep, out_panel))
    assert jnp.allclose(logit_fb, ref, atol=1e-5, rtol=1e-5)

    print("KERNEL_OK")
</pallas_src>

<mosaic_0001>
module attributes {stable_mosaic.version = 11 : i64} {
  func.func @_linear_kernel(%arg0: i32, %arg1: i32, %arg2: i32, %arg3: memref<8x128xf32, #tpu.memory_space<vmem>>, %arg4: memref<128x128xf32, #tpu.memory_space<vmem>>, %arg5: memref<8x128xf32, #tpu.memory_space<vmem>>) attributes {dimension_semantics = [#tpu.dimension_semantics<parallel>, #tpu.dimension_semantics<parallel>, #tpu.dimension_semantics<arbitrary>], iteration_bounds = array<i64: 1, 1, 1>, scalar_prefetch = 0 : i64, scratch_operands = 0 : i64, tpu.core_type = #tpu.core_type<tc>, window_params = [{transform_indices = @transform_0, window_bounds = array<i64: 8, 128>}, {transform_indices = @transform_1, window_bounds = array<i64: 128, 128>}, {transform_indices = @transform_2, window_bounds = array<i64: 8, 128>}]} {
    %c0_i32 = arith.constant 0 : i32
    %0 = arith.cmpi eq, %arg2, %c0_i32 : i32
    %1 = arith.extui %0 : i1 to i32
    %c0_i32_0 = arith.constant 0 : i32
    %2 = arith.cmpi ne, %1, %c0_i32_0 : i32
    scf.if %2 {
      %cst_8 = arith.constant 0.000000e+00 : f32
      %9 = vector.broadcast %cst_8 : f32 to vector<8x128xf32>
      %c0_9 = arith.constant 0 : index
      %c0_10 = arith.constant 0 : index
      %10 = vector.load %arg5[%c0_9, %c0_10] : memref<8x128xf32, #tpu.memory_space<vmem>>, vector<8x128xf32>
      tpu.vector_store %arg5[%c0_9, %c0_10], %9 {strides = array<i32>} : memref<8x128xf32, #tpu.memory_space<vmem>>, vector<8x128xf32>,
    } else {
    }
    %c0 = arith.constant 0 : index
    %c0_1 = arith.constant 0 : index
    %3 = vector.load %arg5[%c0, %c0_1] : memref<8x128xf32, #tpu.memory_space<vmem>>, vector<8x128xf32>
    %c0_2 = arith.constant 0 : index
    %c0_3 = arith.constant 0 : index
    %4 = vector.load %arg3[%c0_2, %c0_3] : memref<8x128xf32, #tpu.memory_space<vmem>>, vector<8x128xf32>
    %c0_4 = arith.constant 0 : index
    %c0_5 = arith.constant 0 : index
    %5 = vector.load %arg4[%c0_4, %c0_5] : memref<128x128xf32, #tpu.memory_space<vmem>>, vector<128x128xf32>
    %cst = arith.constant dense<0.000000e+00> : vector<8x128xf32>
    %6 = tpu.matmul %4, %5, %cst {dimension_numbers = #tpu.dot_dimension_numbers<[1], [0], [0], [1], [0, 0, 1, 1], [], []>} : vector<8x128xf32>, vector<128x128xf32>, vector<8x128xf32> -> vector<8x128xf32>
    %7 = arith.addf %3, %6 : vector<8x128xf32>
    %c0_6 = arith.constant 0 : index
    %c0_7 = arith.constant 0 : index
    %8 = vector.load %arg5[%c0_6, %c0_7] : memref<8x128xf32, #tpu.memory_space<vmem>>, vector<8x128xf32>
    tpu.vector_store %arg5[%c0_6, %c0_7], %7 {strides = array<i32>} : memref<8x128xf32, #tpu.memory_space<vmem>>, vector<8x128xf32>,
    return
  }
  func.func @transform_0(%arg0: i32, %arg1: i32, %arg2: i32) -> (i32, i32) {
    %c0_i32 = arith.constant 0 : i32
    return %arg1, %arg2 : i32, i32
  }
  func.func @transform_1(%arg0: i32, %arg1: i32, %arg2: i32) -> (i32, i32) {
    %c0_i32 = arith.constant 0 : i32
    return %arg2, %arg0 : i32, i32
  }
  func.func @transform_2(%arg0: i32, %arg1: i32, %arg2: i32) -> (i32, i32) {
    %c0_i32 = arith.constant 0 : i32
    return %arg1, %arg0 : i32, i32
  }
}

</mosaic_0001>

<bundles_post_ra>
// kernel: tpu_custom_call.1
= control target key start
LH: loop header
LB: loop body
LE: loop exit
PB: predicated region body
PF: predicated region fallthrough
CT: control target
= control target key end

     0   :  { %7 = vsyncpa [#allocation3], 0  ;;  %s305_s0 = inlined_call_operand.hbm [shape: f32[8,128], index: 0, kind: input, shape index: {}]   ;;  %s306_s1 = inlined_call_operand.hbm [shape: f32[128,128], index: 1, kind: input, shape index: {}]   ;;  %s307_s2 = inlined_call_operand.hbm [shape: f32[8,128], index: 2, kind: output, shape index: {}]  }
   0x1   :  { %8 = vsyncpa [#allocation6], 0 }
   0x2   :  { %9 = vsyncpa [#allocation4], 0  ;;  %s274_s9 = smov [#allocation2]   ;;  %s275_s11 = smov [#allocation5]  }
   0x3   :  { %s16_s10 = sshll.u32 %s274_s9, 4  ;;  %s25_s12 = sshll.u32 %s275_s11, 4  ;;  %s17_s10 = int_to_ptr.vmem [resolvable:$true] %s16_s10  ;;  %s26_s12 = int_to_ptr.vmem [resolvable:$true] %s25_s12 }
   0x4   :  { %s216_s13 = scalar_lea.vmem %s17_s10, 128  ;;  %p221_p1 = scmp.lt.s32.totalorder %s17_s10, %s17_s10 }
   0x5   :  { %p217_p0 = scmp.ne.s32.totalorder %s17_s10, %s216_s13  ;;  %p222_p2 = scmp.lt.s32.totalorder %s216_s13, %s216_s13 }
   0x7   :  { %p223_p3 = por %p222_p2, %p221_p1 }
   0x9   :  { %p224_p4 = pnand %p223_p3, %p217_p0 }
   0xb   :  { %227 = shalt.err (!%p224_p4)
}
   0xc   :  { %19 = dma.hbm_to_vmem [thread:$0]  %s305_s0, 128, %s17_s10, [#allocation3]  }
   0xd   :  { %s236_s16 = scalar_lea.vmem %s26_s12, 2048  ;;  %p241_p6 = scmp.lt.s32.totalorder %s26_s12, %s26_s12 }
   0xe   :  { %p237_p5 = scmp.ne.s32.totalorder %s26_s12, %s236_s16  ;;  %p242_p7 = scmp.lt.s32.totalorder %s236_s16, %s236_s16 }
  0x10   :  { %p243_p8 = por %p242_p7, %p241_p6 }
  0x12   :  { %p244_p9 = pnand %p243_p8, %p237_p5 }
  0x14   :  { %247 = shalt.err (!%p244_p9)
}
  0x15   :  { %s276_s17 = smov 128   ;;  %s277_s18 = smov 8  }
  0x16   :  { %31 = dma.hbm_to_vmem [thread:$0]  %s306_s1, 2048, %s26_s12, [#allocation6], %s276_s17, %s276_s17, %s277_s18  }
  0x17   :  { %268 = dma.done.wait [#allocation3], 128  }
  0x18   :  { %269 = vsyncadd [#allocation3], 4294967168 }
  0x19   :  { %270 = dma.done.wait [#allocation6], 2048  }
  0x1a   :  { %271 = vsyncadd [#allocation6], 4294965248  ;;  %v278_v0 = vmov 0.0   ;;  %vm279_vm0 = vmmov 0   ;;  %v60_v1 = vld [vmem:[#allocation5 + $0x78] sm:$0xff]  ;;  %v59_v2 = vld [vmem:[#allocation5 + $0x70] sm:$0xff] }
  0x1b   :  { %166 = vmatprep.subr.mxu0 %v278_v0  ;;  %198 = vmatprep.mubr.msk.f32.mxu0 %vm279_vm0, %v278_v0  ;;  %v58_v3 = vld [vmem:[#allocation5 + $0x68] sm:$0xff]  ;;  %v57_v4 = vld [vmem:[#allocation5 + $0x60] sm:$0xff]  ;;  %v56_v5 = vld [vmem:[#allocation5 + $0x58] sm:$0xff]  ;;  %s280_s0 = smov [#allocation7]  }
  0x1c   :  { %167 = vmatpush3.msra.mxu0 %v60_v1  ;;  %v55_v6 = vld [vmem:[#allocation5 + $0x50] sm:$0xff]  ;;  %v54_v7 = vld [vmem:[#allocation5 + $0x48] sm:$0xff]  ;;  %v53_v8 = vld [vmem:[#allocation5 + $0x40] sm:$0xff]  ;;  %s139_s1 = sshll.u32 %s280_s0, 4  ;;  %s140_s1 = int_to_ptr.vmem [resolvable:$true] %s139_s1 }
  0x1d   :  { %168 = vmatprep.subr.mxu0 %v278_v0  ;;  %v52_v9 = vld [vmem:[#allocation5 + $0x38] sm:$0xff]  ;;  %v51_v10 = vld [vmem:[#allocation5 + $0x30] sm:$0xff]  ;;  %v50_v11 = vld [vmem:[#allocation5 + $0x28] sm:$0xff]  ;;  %s248_s21 = scalar_lea.vmem %s140_s1, 128  ;;  %p253_p11 = scmp.lt.s32.totalorder %s140_s1, %s140_s1 }
  0x1e   :  { %169 = vmatpush3.msra.mxu0 %v59_v2  ;;  %v49_v12 = vld [vmem:[#allocation5 + $0x20] sm:$0xff]  ;;  %v48_v13 = vld [vmem:[#allocation5 + $0x18] sm:$0xff]  ;;  %v47_v14 = vld [vmem:[#allocation5 + $0x10] sm:$0xff]  ;;  %p249_p10 = scmp.ne.s32.totalorder %s140_s1, %s248_s21  ;;  %p254_p12 = scmp.lt.s32.totalorder %s248_s21, %s248_s21 }
  0x1f   :  { %170 = vmatprep.subr.mxu0 %v278_v0  ;;  %v46_v15 = vld [vmem:[#allocation5 + $0x8] sm:$0xff]  ;;  %v45_v16 = vld [vmem:[#allocation5] sm:$0xff]  ;;  %v44_v17 = vld [vmem:[#allocation2] sm:$0xff] }
  0x20   :  { %171 = vmatpush3.msra.mxu0 %v58_v3  ;;  %p255_p13 = por %p254_p12, %p253_p11 }
  0x21   :  { %172 = vmatprep.subr.mxu0 %v278_v0 }
  0x22   :  { %173 = vmatpush3.msra.mxu0 %v57_v4  ;;  %p256_p0 = pnand %p255_p13, %p249_p10 }
  0x23   :  { %174 = vmatprep.subr.mxu0 %v278_v0 }
  0x24   :  { %175 = vmatpush3.msra.mxu0 %v56_v5 }
  0x25   :  { %176 = vmatprep.subr.mxu0 %v278_v0 }
  0x26   :  { %177 = vmatpush3.msra.mxu0 %v55_v6 }
  0x27   :  { %178 = vmatprep.subr.mxu0 %v278_v0 }
  0x28   :  { %179 = vmatpush3.msra.mxu0 %v54_v7 }
  0x29   :  { %180 = vmatprep.subr.mxu0 %v278_v0 }
  0x2a   :  { %181 = vmatpush3.msra.mxu0 %v53_v8 }
  0x2b   :  { %182 = vmatprep.subr.mxu0 %v278_v0 }
  0x2c   :  { %183 = vmatpush3.msra.mxu0 %v52_v9 }
  0x2d   :  { %184 = vmatprep.subr.mxu0 %v278_v0 }
  0x2e   :  { %185 = vmatpush3.msra.mxu0 %v51_v10 }
  0x2f   :  { %186 = vmatprep.subr.mxu0 %v278_v0 }
  0x30   :  { %187 = vmatpush3.msra.mxu0 %v50_v11 }
  0x31   :  { %188 = vmatprep.subr.mxu0 %v278_v0 }
  0x32   :  { %189 = vmatpush3.msra.mxu0 %v49_v12 }
  0x33   :  { %190 = vmatprep.subr.mxu0 %v278_v0 }
  0x34   :  { %191 = vmatpush3.msra.mxu0 %v48_v13 }
  0x35   :  { %192 = vmatprep.subr.mxu0 %v278_v0 }
  0x36   :  { %193 = vmatpush3.msra.mxu0 %v47_v14 }
  0x37   :  { %194 = vmatprep.subr.mxu0 %v278_v0 }
  0x38   :  { %195 = vmatpush3.msra.mxu0 %v46_v15 }
  0x39   :  { %196 = vmatprep.subr.mxu0 %v278_v0 }
  0x3a   :  { %197 = vmatpush3.msra.mxu0 %v45_v16 }
  0x3b   :  { %199 = vmatmul.mubr.f32.vlgmr.msra.gmra.mxu0 %v44_v17 }
  0xfb   :  { %v127_v18 = vpop.f32.mrf.mxu0 }
  0xfc   :  { %132 = vst [vmem:[#allocation7] sm:$0xff] %v127_v18 }
  0xfd   :  { %v200_v19 = vpop.f32.mrf.mxu0 }
  0xfe   :  { %259 = shalt.err (!%p256_p0)
}
  0xff   :  { %142 = dma.vmem_to_hbm [thread:$0]  %s140_s1, 128, %s307_s2, [#allocation4]  }
 0x100   :  { %272 = dma.done.wait [#allocation4], 128  }
 0x101   :  { %273 = vsyncadd [#allocation4], 4294967168 }
 0x102   :  { %146 = vsyncpa [#allocation3], 1 }
 0x103   :  { %147 = vsyncpa [#allocation6], 1 }
 0x104   :  { %148 = vsyncpa [#allocation4], 1 }

</bundles_post_ra>
